<compile_context>
chip_gen: v6e
topology: v6e:2x2x1
jax: 0.10.0
libtpu: 0.0.40
codegen_flags: <defaults>
</compile_context>

<pallas_src>
import functools
import math

import jax
import jax.numpy as jnp
from jax.experimental import pallas as pl
from jax.experimental.pallas import tpu as pltpu

LN_EPS = 1e-5  # PyTorch nn.LayerNorm default


def _round_up(n, m):
    return ((n + m - 1) // m) * m


def _default_bf16_elementwise():
    """bf16 VPU/EUP exists on v6e/v7x; keep f32 elementwise on v5e and older."""
    try:
        kind = jax.devices()[0].device_kind.lower()
    except Exception:
        return False
    return ("v6" in kind) or ("v7" in kind)


def _vmem_bytes_estimate(row_tile, d_model_p, d_ff_p, ff_tile, x_bytes, out_bytes):
    # Double-buffered x/out tiles + double-buffered resident bf16 weights +
    # in-kernel temporaries (bf16 xn, f32 accumulator, per-chunk h / swish(h)).
    io = 2 * row_tile * d_model_p * (x_bytes + out_bytes)
    weights = 2 * 2 * 2 * d_model_p * d_ff_p            # W1+W2, bf16, 2 buffers
    vectors = 2 * 4 * (3 * d_model_p + d_ff_p)          # gamma/beta/b1/b2
    temps = row_tile * (2 * d_model_p + 4 * d_model_p + 8 * ff_tile)
    return io + weights + vectors + temps


def _make_kernel(d_model_real, ff_tile, n_ff_chunks, bf16_elementwise):
    inv_d = 1.0 / float(d_model_real)

    def kernel(x_ref, gamma_ref, beta_ref, w1_ref, b1_ref, w2_ref, b2_ref, o_ref):
        f32, bf16 = jnp.float32, jnp.bfloat16
        x = x_ref[...].astype(f32)

        # ---- LayerNorm (single-pass statistics, f32) ----
        # Padded feature lanes of x are zero, so plain sums over all lanes give
        # the real-lane sums; padded lanes of gamma/beta (and W1 rows) are zero,
        # so xn is exactly zero there -> no masking needed.
        s = jnp.sum(x, axis=-1, keepdims=True)
        sq = jnp.sum(x * x, axis=-1, keepdims=True)
        mu = s * inv_d
        var = jnp.maximum(sq * inv_d - mu * mu, 0.0)
        scale = jax.lax.rsqrt(var + LN_EPS) * gamma_ref[...].astype(f32)
        xn = ((x - mu) * scale + beta_ref[...].astype(f32)).astype(bf16)

        # ---- FFN: chunk d_ff in-kernel against VMEM-resident weights ----
        acc = jnp.zeros((x.shape[0], o_ref.shape[-1]), f32)
        for t in range(n_ff_chunks):            # trace-time unrolled, static slices
            lo = t * ff_tile
            hi = lo + ff_tile
            h = jnp.dot(xn, w1_ref[:, lo:hi], preferred_element_type=f32)
            h = h + b1_ref[:, lo:hi].astype(f32)
            if bf16_elementwise:
                hb = h.astype(bf16)              # v6e/v7x: bf16 Swish (native VPU/EUP)
                hs = hb * jax.nn.sigmoid(hb)
            else:
                hs = (h * jax.nn.sigmoid(h)).astype(bf16)   # v5e: f32 Swish
            # dropout1: identity at inference
            acc = acc + jnp.dot(hs, w2_ref[lo:hi, :], preferred_element_type=f32)

        y = acc + b2_ref[...].astype(f32)
        # dropout2: identity at inference
        o_ref[...] = y.astype(o_ref.dtype)

    return kernel


def prepare_ffn_params(gamma, beta, w1, b1, w2, b2):
    """One-time padding / bf16 casting of parameters (hoisted out of the hot path)."""
    d_model, d_ff = w1.shape
    d_model_p = _round_up(d_model, 256)
    d_ff_p = _round_up(d_ff, 256)
    f32, bf16 = jnp.float32, jnp.bfloat16
    pad_m = d_model_p - d_model
    pad_f = d_ff_p - d_ff
    gamma2d = jnp.pad(gamma.astype(f32).reshape(1, d_model), ((0, 0), (0, pad_m)))
    beta2d = jnp.pad(beta.astype(f32).reshape(1, d_model), ((0, 0), (0, pad_m)))
    w1p = jnp.pad(w1.astype(bf16), ((0, pad_m), (0, pad_f)))
    b1p = jnp.pad(b1.astype(f32).reshape(1, d_ff), ((0, 0), (0, pad_f)))
    w2p = jnp.pad(w2.astype(bf16), ((0, pad_f), (0, pad_m)))
    b2p = jnp.pad(b2.astype(f32).reshape(1, d_model), ((0, 0), (0, pad_m)))
    return (gamma2d, beta2d, w1p, b1p, w2p, b2p)


@functools.partial(jax.jit, static_argnames=("row_tile", "bf16_elementwise"))
def _ffn_apply(x, gamma2d, beta2d, w1p, b1p, w2p, b2p, *, row_tile, bf16_elementwise):
    orig_shape = x.shape
    d_model = x.shape[-1]
    rows = math.prod(x.shape[:-1])
    d_model_p, d_ff_p = w1p.shape

    # d_ff chunk: largest of 512 / 256 dividing the padded d_ff (always a 256 multiple).
    ff_tile = 512 if d_ff_p % 512 == 0 else 256
    ff_tile = min(ff_tile, d_ff_p)
    n_ff_chunks = d_ff_p // ff_tile

    # Row tile: start from the request, shrink while the VMEM estimate is over budget.
    row_tile_eff = min(row_tile, _round_up(rows, 8))
    budget = 36 * 1024 * 1024
    while row_tile_eff > 256 and _vmem_bytes_estimate(
            row_tile_eff, d_model_p, d_ff_p, ff_tile,
            x.dtype.itemsize, x.dtype.itemsize) > budget:
        row_tile_eff //= 2
    rows_p = _round_up(rows, row_tile_eff)

    # Only copy/pad the activations when actually misaligned.
    x2d = x.reshape(rows, d_model)
    padded = (rows_p != rows) or (d_model_p != d_model)
    if padded:
        x2d = jnp.pad(x2d, ((0, rows_p - rows), (0, d_model_p - d_model)))

    grid = (rows_p // row_tile_eff,)

    out2d = pl.pallas_call(
        _make_kernel(d_model, ff_tile, n_ff_chunks, bf16_elementwise),
        out_shape=jax.ShapeDtypeStruct((rows_p, d_model_p), x.dtype),
        grid_spec=pltpu.PrefetchScalarGridSpec(
            num_scalar_prefetch=0,
            grid=grid,
            in_specs=[
                pl.BlockSpec((row_tile_eff, d_model_p), lambda i: (i, 0)),  # x tile
                pl.BlockSpec((1, d_model_p), lambda i: (0, 0)),             # gamma
                pl.BlockSpec((1, d_model_p), lambda i: (0, 0)),             # beta
                pl.BlockSpec((d_model_p, d_ff_p), lambda i: (0, 0)),        # W1 (resident)
                pl.BlockSpec((1, d_ff_p), lambda i: (0, 0)),                # b1
                pl.BlockSpec((d_ff_p, d_model_p), lambda i: (0, 0)),        # W2 (resident)
                pl.BlockSpec((1, d_model_p), lambda i: (0, 0)),             # b2
            ],
            out_specs=pl.BlockSpec((row_tile_eff, d_model_p), lambda i: (i, 0)),
        ),
        compiler_params=pltpu.CompilerParams(
            dimension_semantics=("parallel",),
            vmem_limit_bytes=48 * 1024 * 1024),
    )(x2d, gamma2d, beta2d, w1p, b1p, w2p, b2p)

    if padded:
        out2d = out2d[:rows, :d_model]
    return out2d.reshape(orig_shape)


def feed_forward_conformer(x, params, *, row_tile=1024, bf16_elementwise=None):
    """x: (..., d_model) -> (..., d_model). `params` from prepare_ffn_params()."""
    if bf16_elementwise is None:
        bf16_elementwise = _default_bf16_elementwise()
    return _ffn_apply(x, *params, row_tile=int(row_tile),
                      bf16_elementwise=bool(bf16_elementwise))


# ---------------------------------------------------------------------------
# References
# ---------------------------------------------------------------------------
def reference_forward_f32(x, gamma, beta, w1, b1, w2, b2):
    xf = x.astype(jnp.float32)
    mu = jnp.mean(xf, axis=-1, keepdims=True)
    var = jnp.mean((xf - mu) ** 2, axis=-1, keepdims=True)
    xn = (xf - mu) / jnp.sqrt(var + LN_EPS) * gamma + beta
    h = xn @ w1 + b1
    h = h * jax.nn.sigmoid(h)
    y = h @ w2 + b2
    return y.astype(x.dtype)


def reference_forward_matched(x, gamma, beta, w1, b1, w2, b2, *, bf16_elementwise):
    # Mirrors kernel precision: bf16 MXU operands, f32 accumulation,
    # optional bf16 bias+Swish (v6e/v7x path).
    bf16, f32 = jnp.bfloat16, jnp.float32
    xf = x.astype(f32)
    mu = jnp.mean(xf, axis=-1, keepdims=True)
    var = jnp.mean((xf - mu) ** 2, axis=-1, keepdims=True)
    xn = (xf - mu) * (jax.lax.rsqrt(var + LN_EPS) * gamma) + beta
    h = jnp.dot(xn.astype(bf16), w1.astype(bf16), preferred_element_type=f32) + b1
    if bf16_elementwise:
        hb = h.astype(bf16)
        hs = hb * jax.nn.sigmoid(hb)
    else:
        hs = (h * jax.nn.sigmoid(h)).astype(bf16)
    y = jnp.dot(hs, w2.astype(bf16), preferred_element_type=f32) + b2
    return y.astype(x.dtype)


if __name__ == "__main__":
    # Small shapes consistent with the module: batch=2, seq=8, d_model=32, d_ff=64
    B, S, d_model, d_ff = 2, 8, 32, 64

    key = jax.random.PRNGKey(0)
    kx, kw1, kb1, kw2, kb2 = jax.random.split(key, 5)

    x = jax.random.normal(kx, (B, S, d_model), dtype=jnp.float32)

    # Deterministic parameter init (PyTorch-like uniform fan-in bounds).
    gamma = jnp.ones((d_model,), jnp.float32)
    beta = jnp.zeros((d_model,), jnp.float32)
    lim1 = 1.0 / math.sqrt(d_model)
    lim2 = 1.0 / math.sqrt(d_ff)
    w1 = jax.random.uniform(kw1, (d_model, d_ff), jnp.float32, -lim1, lim1)
    b1 = jax.random.uniform(kb1, (d_ff,), jnp.float32, -lim1, lim1)
    w2 = jax.random.uniform(kw2, (d_ff, d_model), jnp.float32, -lim2, lim2)
    b2 = jax.random.uniform(kb2, (d_model,), jnp.float32, -lim2, lim2)

    bf16_elem = _default_bf16_elementwise()
    params = prepare_ffn_params(gamma, beta, w1, b1, w2, b2)  # one-time prep

    out = feed_forward_conformer(x, params, bf16_elementwise=bf16_elem)
    out = jax.block_until_ready(out)
    assert out.shape == (B, S, d_model)

    # Tight check against a reference with matching (bf16-matmul) precision.
    ref_matched = reference_forward_matched(
        x, gamma, beta, w1, b1, w2, b2, bf16_elementwise=bf16_elem)
    assert jnp.allclose(out, ref_matched, atol=3e-3, rtol=3e-3), \
        "mismatch vs precision-matched reference"

    # Loose sanity check against the full-f32 module semantics.
    ref_f32 = reference_forward_f32(x, gamma, beta, w1, b1, w2, b2)
    assert jnp.allclose(out, ref_f32, atol=5e-2, rtol=5e-2), \
        "mismatch vs f32 reference"

    print("KERNEL_OK")
</pallas_src>

<mosaic_0001>
module attributes {stable_mosaic.version = 11 : i64} {
  func.func @kernel(%arg0: i32, %arg1: memref<16x256xf32, #tpu.memory_space<vmem>>, %arg2: memref<1x256xf32, #tpu.memory_space<vmem>>, %arg3: memref<1x256xf32, #tpu.memory_space<vmem>>, %arg4: memref<256x256xbf16, #tpu.memory_space<vmem>>, %arg5: memref<1x256xf32, #tpu.memory_space<vmem>>, %arg6: memref<256x256xbf16, #tpu.memory_space<vmem>>, %arg7: memref<1x256xf32, #tpu.memory_space<vmem>>, %arg8: memref<16x256xf32, #tpu.memory_space<vmem>>) attributes {dimension_semantics = [#tpu.dimension_semantics<parallel>], iteration_bounds = array<i64: 1>, scalar_prefetch = 0 : i64, scratch_operands = 0 : i64, tpu.core_type = #tpu.core_type<tc>, window_params = [{transform_indices = @transform_0, window_bounds = array<i64: 16, 256>}, {pipeline_mode = #tpu.pipeline_mode<synchronous>, transform_indices = @transform_1, window_bounds = array<i64: 1, 256>}, {pipeline_mode = #tpu.pipeline_mode<synchronous>, transform_indices = @transform_2, window_bounds = array<i64: 1, 256>}, {pipeline_mode = #tpu.pipeline_mode<synchronous>, transform_indices = @transform_3, window_bounds = array<i64: 256, 256>}, {pipeline_mode = #tpu.pipeline_mode<synchronous>, transform_indices = @transform_4, window_bounds = array<i64: 1, 256>}, {pipeline_mode = #tpu.pipeline_mode<synchronous>, transform_indices = @transform_5, window_bounds = array<i64: 256, 256>}, {pipeline_mode = #tpu.pipeline_mode<synchronous>, transform_indices = @transform_6, window_bounds = array<i64: 1, 256>}, {transform_indices = @transform_7, window_bounds = array<i64: 16, 256>}]} {
    %c0 = arith.constant 0 : index
    %c0_0 = arith.constant 0 : index
    %0 = vector.load %arg1[%c0, %c0_0] : memref<16x256xf32, #tpu.memory_space<vmem>>, vector<16x256xf32>
    %cst = arith.constant dense<0.000000e+00> : vector<16xf32>
    %1 = vector.multi_reduction <add>, %0, %cst [1] : vector<16x256xf32> to vector<16xf32>
    %2 = vector.shape_cast %1 : vector<16xf32> to vector<16x1xf32>
    %3 = arith.mulf %0, %0 : vector<16x256xf32>
    %cst_1 = arith.constant dense<0.000000e+00> : vector<16xf32>
    %4 = vector.multi_reduction <add>, %3, %cst_1 [1] : vector<16x256xf32> to vector<16xf32>
    %5 = vector.shape_cast %4 : vector<16xf32> to vector<16x1xf32>
    %cst_2 = arith.constant 3.125000e-02 : f32
    %6 = vector.broadcast %cst_2 : f32 to vector<16x1xf32>
    %7 = arith.mulf %2, %6 : vector<16x1xf32>
    %cst_3 = arith.constant 3.125000e-02 : f32
    %8 = vector.broadcast %cst_3 : f32 to vector<16x1xf32>
    %9 = arith.mulf %5, %8 : vector<16x1xf32>
    %10 = arith.mulf %7, %7 : vector<16x1xf32>
    %11 = arith.subf %9, %10 : vector<16x1xf32>
    %cst_4 = arith.constant 0.000000e+00 : f32
    %12 = vector.broadcast %cst_4 : f32 to vector<16x1xf32>
    %13 = arith.maximumf %11, %12 : vector<16x1xf32>
    %cst_5 = arith.constant 9.99999974E-6 : f32
    %14 = vector.broadcast %cst_5 : f32 to vector<16x1xf32>
    %15 = arith.addf %13, %14 : vector<16x1xf32>
    %16 = math.rsqrt %15 : vector<16x1xf32>
    %c0_6 = arith.constant 0 : index
    %c0_7 = arith.constant 0 : index
    %17 = vector.load %arg2[%c0_6, %c0_7] : memref<1x256xf32, #tpu.memory_space<vmem>>, vector<1x256xf32>
    %18 = vector.broadcast %16 : vector<16x1xf32> to vector<16x256xf32>
    %19 = vector.broadcast %17 : vector<1x256xf32> to vector<16x256xf32>
    %20 = arith.mulf %18, %19 : vector<16x256xf32>
    %21 = vector.broadcast %7 : vector<16x1xf32> to vector<16x256xf32>
    %22 = arith.subf %0, %21 : vector<16x256xf32>
    %23 = arith.mulf %22, %20 : vector<16x256xf32>
    %c0_8 = arith.constant 0 : index
    %c0_9 = arith.constant 0 : index
    %24 = vector.load %arg3[%c0_8, %c0_9] : memref<1x256xf32, #tpu.memory_space<vmem>>, vector<1x256xf32>
    %25 = vector.broadcast %24 : vector<1x256xf32> to vector<16x256xf32>
    %26 = arith.addf %23, %25 : vector<16x256xf32>
    %27 = arith.truncf %26 : vector<16x256xf32> to vector<16x256xbf16>
    %cst_10 = arith.constant 0.000000e+00 : f32
    %28 = vector.broadcast %cst_10 : f32 to vector<16x256xf32>
    %c0_11 = arith.constant 0 : index
    %c0_12 = arith.constant 0 : index
    %29 = vector.load %arg4[%c0_11, %c0_12] : memref<256x256xbf16, #tpu.memory_space<vmem>>, vector<256x256xbf16>
    %cst_13 = arith.constant dense<0.000000e+00> : vector<16x256xf32>
    %30 = tpu.matmul %27, %29, %cst_13 {dimension_numbers = #tpu.dot_dimension_numbers<[1], [0], [0], [1], [0, 0, 1, 1], [], []>} : vector<16x256xbf16>, vector<256x256xbf16>, vector<16x256xf32> -> vector<16x256xf32>
    %c0_14 = arith.constant 0 : index
    %c0_15 = arith.constant 0 : index
    %31 = vector.load %arg5[%c0_14, %c0_15] : memref<1x256xf32, #tpu.memory_space<vmem>>, vector<1x256xf32>
    %32 = vector.broadcast %31 : vector<1x256xf32> to vector<16x256xf32>
    %33 = arith.addf %30, %32 : vector<16x256xf32>
    %34 = arith.negf %33 : vector<16x256xf32>
    %35 = math.exp %34 : vector<16x256xf32>
    %cst_16 = arith.constant 1.000000e+00 : f32
    %36 = vector.broadcast %cst_16 : f32 to vector<16x256xf32>
    %37 = arith.addf %36, %35 : vector<16x256xf32>
    %38 = arith.divf %36, %37 : vector<16x256xf32>
    %39 = arith.mulf %33, %38 : vector<16x256xf32>
    %40 = arith.truncf %39 : vector<16x256xf32> to vector<16x256xbf16>
    %c0_17 = arith.constant 0 : index
    %c0_18 = arith.constant 0 : index
    %41 = vector.load %arg6[%c0_17, %c0_18] : memref<256x256xbf16, #tpu.memory_space<vmem>>, vector<256x256xbf16>
    %cst_19 = arith.constant dense<0.000000e+00> : vector<16x256xf32>
    %42 = tpu.matmul %40, %41, %cst_19 {dimension_numbers = #tpu.dot_dimension_numbers<[1], [0], [0], [1], [0, 0, 1, 1], [], []>} : vector<16x256xbf16>, vector<256x256xbf16>, vector<16x256xf32> -> vector<16x256xf32>
    %43 = arith.addf %28, %42 : vector<16x256xf32>
    %c0_20 = arith.constant 0 : index
    %c0_21 = arith.constant 0 : index
    %44 = vector.load %arg7[%c0_20, %c0_21] : memref<1x256xf32, #tpu.memory_space<vmem>>, vector<1x256xf32>
    %45 = vector.broadcast %44 : vector<1x256xf32> to vector<16x256xf32>
    %46 = arith.addf %43, %45 : vector<16x256xf32>
    %c0_22 = arith.constant 0 : index
    %c0_23 = arith.constant 0 : index
    %47 = vector.load %arg8[%c0_22, %c0_23] : memref<16x256xf32, #tpu.memory_space<vmem>>, vector<16x256xf32>
    tpu.vector_store %arg8[%c0_22, %c0_23], %46 {strides = array<i32>} : memref<16x256xf32, #tpu.memory_space<vmem>>, vector<16x256xf32>,
    return
  }
  func.func @transform_0(%arg0: i32) -> (i32, i32) {
    %c0_i32 = arith.constant 0 : i32
    %c0_i32_0 = arith.constant 0 : i32
    return %arg0, %c0_i32 : i32, i32
  }
  func.func @transform_1(%arg0: i32) -> (i32, i32) {
    %c0_i32 = arith.constant 0 : i32
    %c0_i32_0 = arith.constant 0 : i32
    %c0_i32_1 = arith.constant 0 : i32
    return %c0_i32, %c0_i32_0 : i32, i32
  }
  func.func @transform_2(%arg0: i32) -> (i32, i32) {
    %c0_i32 = arith.constant 0 : i32
    %c0_i32_0 = arith.constant 0 : i32
    %c0_i32_1 = arith.constant 0 : i32
    return %c0_i32, %c0_i32_0 : i32, i32
  }
  func.func @transform_3(%arg0: i32) -> (i32, i32) {
    %c0_i32 = arith.constant 0 : i32
    %c0_i32_0 = arith.constant 0 : i32
    %c0_i32_1 = arith.constant 0 : i32
    return %c0_i32, %c0_i32_0 : i32, i32
  }
  func.func @transform_4(%arg0: i32) -> (i32, i32) {
    %c0_i32 = arith.constant 0 : i32
    %c0_i32_0 = arith.constant 0 : i32
    %c0_i32_1 = arith.constant 0 : i32
    return %c0_i32, %c0_i32_0 : i32, i32
  }
  func.func @transform_5(%arg0: i32) -> (i32, i32) {
    %c0_i32 = arith.constant 0 : i32
    %c0_i32_0 = arith.constant 0 : i32
    %c0_i32_1 = arith.constant 0 : i32
    return %c0_i32, %c0_i32_0 : i32, i32
  }
  func.func @transform_6(%arg0: i32) -> (i32, i32) {
    %c0_i32 = arith.constant 0 : i32
    %c0_i32_0 = arith.constant 0 : i32
    %c0_i32_1 = arith.constant 0 : i32
    return %c0_i32, %c0_i32_0 : i32, i32
  }
  func.func @transform_7(%arg0: i32) -> (i32, i32) {
    %c0_i32 = arith.constant 0 : i32
    %c0_i32_0 = arith.constant 0 : i32
    return %arg0, %c0_i32 : i32, i32
  }
}

</mosaic_0001>

<bundles_post_ra>
// kernel: _ffn_apply.1
= control target key start
LH: loop header
LB: loop body
LE: loop exit
PB: predicated region body
PF: predicated region fallthrough
CT: control target
= control target key end

     0   :  { %12 = vsyncpa [#allocation3], 0  ;;  %s1018_s0 = inlined_call_operand.vmem [shape: f32[16,256], index: 0, kind: input, shape index: {}]   ;;  %s1019_s1 = inlined_call_operand.vmem [shape: f32[1,256], index: 1, kind: input, shape index: {}]   ;;  %s1020_s2 = inlined_call_operand.vmem [shape: f32[1,256], index: 2, kind: input, shape index: {}]   ;;  %s1021_s3 = inlined_call_operand.hbm [shape: bf16[256,256], index: 3, kind: input, shape index: {}]   ;;  %s1022_s4 = inlined_call_operand.vmem [shape: f32[1,256], index: 4, kind: input, shape index: {}]   ;;  %s1023_s5 = inlined_call_operand.hbm [shape: bf16[256,256], index: 5, kind: input, shape index: {}]   ;;  %s1024_s6 = inlined_call_operand.vmem [shape: f32[1,256], index: 6, kind: input, shape index: {}]   ;;  %s1025_s7 = inlined_call_operand.vmem [shape: f32[16,256], index: 7, kind: output, shape index: {}]  }
   0x1   :  { %13 = vsyncpa [#allocation5], 0  ;;  %s896_s24 = smov [#allocation2]  }
   0x2   :  { %s25_s25 = sshll.u32 %s896_s24, 4  ;;  %s26_s25 = int_to_ptr.vmem [resolvable:$true] %s25_s25 }
   0x3   :  { %s860_s26 = scalar_lea.vmem %s26_s25, 4096  ;;  %p865_p1 = scmp.lt.s32.totalorder %s26_s25, %s26_s25 }
   0x4   :  { %p861_p0 = scmp.ne.s32.totalorder %s26_s25, %s860_s26  ;;  %p866_p2 = scmp.lt.s32.totalorder %s860_s26, %s860_s26 }
   0x6   :  { %p867_p3 = por %p866_p2, %p865_p1 }
   0x8   :  { %p868_p4 = pnand %p867_p3, %p861_p0 }
   0xa   :  { %871 = shalt.err (!%p868_p4)
}
   0xb   :  { %s897_s27 = smov 128   ;;  %s898_s28 = smov 8  }
   0xc   :  { %31 = dma.hbm_to_vmem [thread:$0]  %s1021_s3, 4096, %s26_s25, [#allocation3], %s897_s27, %s897_s27, %s898_s28  }
   0xd   :  { %s899_s8 = smov [#allocation4]  }
   0xe   :  { %s39_s9 = sshll.u32 %s899_s8, 4  ;;  %s40_s9 = int_to_ptr.vmem [resolvable:$true] %s39_s9 }
   0xf   :  { %s880_s10 = scalar_lea.vmem %s40_s9, 4096  ;;  %p885_p6 = scmp.lt.s32.totalorder %s40_s9, %s40_s9 }
  0x10   :  { %p881_p5 = scmp.ne.s32.totalorder %s40_s9, %s880_s10  ;;  %p886_p7 = scmp.lt.s32.totalorder %s880_s10, %s880_s10 }
  0x12   :  { %p887_p8 = por %p886_p7, %p885_p6 }
  0x14   :  { %p888_p9 = pnand %p887_p8, %p881_p5 }
  0x16   :  { %891 = shalt.err (!%p888_p9)
}
  0x17   :  { %45 = dma.hbm_to_vmem [thread:$0]  %s1023_s5, 4096, %s40_s9, [#allocation5], %s897_s27, %s897_s27, %s898_s28  }
  0x18   :  { %892 = dma.done.wait [#allocation3], 4096  }
  0x19   :  { %893 = vsyncadd [#allocation3], 4294963200 }
  0x1a   :  { %894 = dma.done.wait [#allocation5], 4096  }
  0x1b   :  { %895 = vsyncadd [#allocation5], 4294963200  ;;  %v949_v0 = vld [vmem:[%s1018_s0] sm:$0xff]  ;;  %v954_v1 = vld [vmem:[%s1018_s0 + $0x8] sm:$0xff] }
  0x1c   :  { %v959_v2 = vld [vmem:[%s1018_s0 + $0x10] sm:$0xff]  ;;  %v58_v3 = vadd.f32 %v954_v1, %v949_v0  ;;  %v64_v4 = vmul.f32 %v949_v0, %v949_v0  ;;  %v65_v5 = vmul.f32 %v954_v1, %v954_v1  ;;  %v970_v6 = vld [vmem:[%s1018_s0 + $0x18] sm:$0xff]  ;;  %v739_v13 = vld [vmem:[#allocation2 + $0x64] ss:$8 sps:$4 sm:$0xff]  }
  0x1d   :  { %v66_v7 = vmul.f32 %v959_v2, %v959_v2  ;;  %v67_v8 = vmul.f32 %v970_v6, %v970_v6  ;;  %v736_v9 = vld [vmem:[#allocation2 + $0x74] ss:$8 sps:$4 sm:$0xff]   ;;  %v738_v10 = vld [vmem:[#allocation2 + $0x70] ss:$8 sps:$4 sm:$0xff]   ;;  %v61_v12 = vadd.f32 %v970_v6, %v959_v2  ;;  %v741_v15 = vld [vmem:[#allocation2 + $0x60] ss:$8 sps:$4 sm:$0xff]  }
  0x1e   :  { %59 = vadd.xlane.f32.xlu0 %v58_v3  ;;  %v68_v11 = vadd.f32 %v65_v5, %v64_v4  ;;  %334 = vmatprep.subr.bf16.mxu0 %v736_v9  ;;  %v742_v16 = vld [vmem:[#allocation2 + $0x54] ss:$8 sps:$4 sm:$0xff]   ;;  %v744_v17 = vld [vmem:[#allocation2 + $0x50] ss:$8 sps:$4 sm:$0xff]   ;;  %v745_v18 = vld [vmem:[#allocation2 + $0x44] ss:$8 sps:$4 sm:$0xff]  }
  0x1f   :  { %v71_v14 = vadd.f32 %v67_v8, %v66_v7  ;;  %335 = vmatpush1.bf16.msra.mxu0 %v738_v10  ;;  %v747_v19 = vld [vmem:[#allocation2 + $0x40] ss:$8 sps:$4 sm:$0xff]   ;;  %v748_v20 = vld [vmem:[#allocation2 + $0x34] ss:$8 sps:$4 sm:$0xff]   ;;  %v750_v21 = vld [vmem:[#allocation2 + $0x30] ss:$8 sps:$4 sm:$0xff]   ;;  %v90_v8 = vlaneseq }
  0x20   :  { %69 = vadd.xlane.f32.xlu1 %v68_v11  ;;  %336 = vmatprep.subr.bf16.mxu0 %v739_v13  ;;  %v751_v22 = vld [vmem:[#allocation2 + $0x24] ss:$8 sps:$4 sm:$0xff]   ;;  %v753_v23 = vld [vmem:[#allocation2 + $0x20] ss:$8 sps:$4 sm:$0xff]   ;;  %v754_v24 = vld [vmem:[#allocation2 + $0x14] ss:$8 sps:$4 sm:$0xff]  }
  0x21   :  { %v756_v25 = vld [vmem:[#allocation2 + $0x10] ss:$8 sps:$4 sm:$0xff]   ;;  %v757_v26 = vld [vmem:[#allocation2 + $0x4] ss:$8 sps:$4 sm:$0xff]   ;;  %v759_v27 = vld [vmem:[#allocation2] ss:$8 sps:$4 sm:$0xff]  }
  0x22   :  { %62 = vadd.xlane.f32.xlu0 %v61_v12  ;;  %v760_v28 = vld [vmem:[#allocation2 + $0xf4] ss:$8 sps:$4 sm:$0xff]   ;;  %v762_v29 = vld [vmem:[#allocation2 + $0xf0] ss:$8 sps:$4 sm:$0xff]   ;;  %v763_v30 = vld [vmem:[#allocation2 + $0xe4] ss:$8 sps:$4 sm:$0xff]  }
  0x23   :  { %337 = vmatpush1.bf16.msra.mxu0 %v741_v15  ;;  %v765_v31 = vld [vmem:[#allocation2 + $0xe0] ss:$8 sps:$4 sm:$0xff]   ;;  %v766_v32 = vld [vmem:[#allocation2 + $0xd4] ss:$8 sps:$4 sm:$0xff]   ;;  %v768_v33 = vld [vmem:[#allocation2 + $0xd0] ss:$8 sps:$4 sm:$0xff]  }
  0x24   :  { %72 = vadd.xlane.f32.xlu1 %v71_v14  ;;  %338 = vmatprep.subr.bf16.mxu0 %v742_v16  ;;  %v769_v34 = vld [vmem:[#allocation2 + $0xc4] ss:$8 sps:$4 sm:$0xff]   ;;  %v771_v35 = vld [vmem:[#allocation2 + $0xc0] ss:$8 sps:$4 sm:$0xff]   ;;  %v772_v36 = vld [vmem:[#allocation2 + $0xb4] ss:$8 sps:$4 sm:$0xff]  }
  0x25   :  { %v774_v37 = vld [vmem:[#allocation2 + $0xb0] ss:$8 sps:$4 sm:$0xff]   ;;  %v775_v38 = vld [vmem:[#allocation2 + $0xa4] ss:$8 sps:$4 sm:$0xff]   ;;  %v784_v39 = vld [vmem:[#allocation4 + $0x74] ss:$8 sps:$4 sm:$0xff]  }
  0x26   :  { %v786_v40 = vld [vmem:[#allocation4 + $0x70] ss:$8 sps:$4 sm:$0xff]   ;;  %v787_v41 = vld [vmem:[#allocation4 + $0x64] ss:$8 sps:$4 sm:$0xff]   ;;  %v777_v42 = vld [vmem:[#allocation2 + $0xa0] ss:$8 sps:$4 sm:$0xff]   ;;  %611 = vmatprep.subr.bf16.mxu1 %v784_v39 }
  0x27   :  { %339 = vmatpush1.bf16.msra.mxu0 %v744_v17  ;;  %v778_v43 = vld [vmem:[#allocation2 + $0x94] ss:$8 sps:$4 sm:$0xff]   ;;  %612 = vmatpush1.bf16.msra.mxu1 %v786_v40  ;;  %v789_v44 = vld [vmem:[#allocation4 + $0x60] ss:$8 sps:$4 sm:$0xff]   ;;  %v780_v46 = vld [vmem:[#allocation2 + $0x90] ss:$8 sps:$4 sm:$0xff]  }
  0x28   :  { %340 = vmatprep.subr.bf16.mxu0 %v745_v18  ;;  %613 = vmatprep.subr.bf16.mxu1 %v787_v41  ;;  %v790_v45 = vld [vmem:[#allocation4 + $0x54] ss:$8 sps:$4 sm:$0xff]   ;;  %v781_v47 = vld [vmem:[#allocation2 + $0x84] ss:$8 sps:$4 sm:$0xff]   ;;  %v792_v48 = vld [vmem:[#allocation4 + $0x50] ss:$8 sps:$4 sm:$0xff]  }
  0x29   :  { %v793_v49 = vld [vmem:[#allocation4 + $0x44] ss:$8 sps:$4 sm:$0xff]   ;;  %v783_v50 = vld [vmem:[#allocation2 + $0x80] ss:$8 sps:$4 sm:$0xff]   ;;  %v796_v52 = vld [vmem:[#allocation4 + $0x34] ss:$8 sps:$4 sm:$0xff]  }
  0x2a   :  { %v795_v51 = vld [vmem:[#allocation4 + $0x40] ss:$8 sps:$4 sm:$0xff]   ;;  %v798_v53 = vld [vmem:[#allocation4 + $0x30] ss:$8 sps:$4 sm:$0xff]   ;;  %v91_v11 = vshrl.u32 %v90_v8, 7 }
  0x2b   :  { %341 = vmatpush1.bf16.msra.mxu0 %v747_v19  ;;  %614 = vmatpush1.bf16.msra.mxu1 %v789_v44  ;;  %v88_v14 = vld [vmem:[%s1019_s1] sm:$0x3]  ;;  %v804_v39 = vld [vmem:[#allocation4 + $0x10] ss:$8 sps:$4 sm:$0xff]   ;;  %v805_v40 = vld [vmem:[#allocation4 + $0x4] ss:$8 sps:$4 sm:$0xff]  }
  0x2c   :  { %342 = vmatprep.subr.bf16.mxu0 %v748_v20  ;;  %615 = vmatprep.subr.bf16.mxu1 %v790_v45  ;;  %v978_v12 = vsub.s32 0, %v91_v11  ;;  %v980_v13 = vsub.s32 1, %v91_v11  ;;  %v112_v19 = vld [vmem:[%s1020_s2] sm:$0x3]  ;;  %v811_v44 = vld [vmem:[#allocation4 + $0xe4] ss:$8 sps:$4 sm:$0xff]  }
  0x2d   :  { %v807_v41 = vld [vmem:[#allocation4] ss:$8 sps:$4 sm:$0xff]  }
  0x2e   :  { %v93_v15 = vrot.slane %v88_v14, %v978_v12  ;;  %v97_v16 = vrot.slane %v88_v14, %v980_v13  ;;  %v813_v45 = vld [vmem:[#allocation4 + $0xe0] ss:$8 sps:$4 sm:$0xff]  }
  0x2f   :  { %343 = vmatpush1.bf16.msra.mxu0 %v750_v21  ;;  %616 = vmatpush1.bf16.msra.mxu1 %v792_v48  ;;  %v817_v48 = vld [vmem:[#allocation4 + $0xc4] ss:$8 sps:$4 sm:$0xff]  }
  0x30   :  { %344 = vmatprep.subr.bf16.mxu0 %v751_v22  ;;  %617 = vmatprep.subr.bf16.mxu1 %v793_v49  ;;  %v819_v49 = vld [vmem:[#allocation4 + $0xc0] ss:$8 sps:$4 sm:$0xff]  }
  0x33   :  { %345 = vmatpush1.bf16.msra.mxu0 %v753_v23  ;;  %618 = vmatpush1.bf16.msra.mxu1 %v795_v51  ;;  %v822_v51 = vld [vmem:[#allocation4 + $0xb0] ss:$8 sps:$4 sm:$0xff]  }
  0x34   :  { %346 = vmatprep.subr.bf16.mxu0 %v754_v24  ;;  %619 = vmatprep.subr.bf16.mxu1 %v796_v52  ;;  %v823_v52 = vld [vmem:[#allocation4 + $0xa4] ss:$8 sps:$4 sm:$0xff]  }
  0x37   :  { %347 = vmatpush1.bf16.msra.mxu0 %v756_v25  ;;  %620 = vmatpush1.bf16.msra.mxu1 %v798_v53  ;;  %v825_v53 = vld [vmem:[#allocation4 + $0xa0] ss:$8 sps:$4 sm:$0xff]  }
  0x38   :  { %348 = vmatprep.subr.bf16.mxu0 %v757_v26  ;;  %v117_v26 = vrot.slane %v112_v19, %v978_v12 }
  0x3b   :  { %349 = vmatpush1.bf16.msra.mxu0 %v759_v27  ;;  %v121_v27 = vrot.slane %v112_v19, %v980_v13 }
  0x3c   :  { %350 = vmatprep.subr.bf16.mxu0 %v760_v28 }
  0x3f   :  { %351 = vmatpush2.bf16.msra.mxu0 %v762_v29 }
  0x40   :  { %352 = vmatprep.subr.bf16.mxu0 %v763_v30 }
  0x43   :  { %353 = vmatpush2.bf16.msra.mxu0 %v765_v31 }
  0x44   :  { %354 = vmatprep.subr.bf16.mxu0 %v766_v32 }
  0x47   :  { %355 = vmatpush2.bf16.msra.mxu0 %v768_v33 }
  0x48   :  { %356 = vmatprep.subr.bf16.mxu0 %v769_v34 }
  0x4b   :  { %357 = vmatpush2.bf16.msra.mxu0 %v771_v35 }
  0x4c   :  { %358 = vmatprep.subr.bf16.mxu0 %v772_v36 }
  0x4f   :  { %359 = vmatpush2.bf16.msra.mxu0 %v774_v37 }
  0x50   :  { %360 = vmatprep.subr.bf16.mxu0 %v775_v38  ;;  %v802_v38 = vld [vmem:[#allocation4 + $0x14] ss:$8 sps:$4 sm:$0xff]  }
  0x53   :  { %361 = vmatpush2.bf16.msra.mxu0 %v777_v42  ;;  %v808_v42 = vld [vmem:[#allocation4 + $0xf4] ss:$8 sps:$4 sm:$0xff]  }
  0x54   :  { %362 = vmatprep.subr.bf16.mxu0 %v778_v43  ;;  %v810_v43 = vld [vmem:[#allocation4 + $0xf0] ss:$8 sps:$4 sm:$0xff]  }
  0x57   :  { %363 = vmatpush2.bf16.msra.mxu0 %v780_v46  ;;  %v814_v46 = vld [vmem:[#allocation4 + $0xd4] ss:$8 sps:$4 sm:$0xff]  }
  0x58   :  { %364 = vmatprep.subr.bf16.mxu0 %v781_v47  ;;  %v816_v47 = vld [vmem:[#allocation4 + $0xd0] ss:$8 sps:$4 sm:$0xff]  }
  0x5b   :  { %365 = vmatpush2.bf16.msra.mxu0 %v783_v50  ;;  %v820_v50 = vld [vmem:[#allocation4 + $0xb4] ss:$8 sps:$4 sm:$0xff]  }
  0xa7   :  { %v60_v54 = vpop.xlane.xlu0 %59 }
  0xa8   :  { %v74_v55 = vmul.f32 0.03125, %v60_v54  ;;  %v826_v54 = vld [vmem:[#allocation4 + $0x94] ss:$8 sps:$4 sm:$0xff]  }
  0xa9   :  { %v70_v56 = vpop.xlane.xlu1 %69 }
  0xaa   :  { %v76_v57 = vmul.f32 0.03125, %v70_v56  ;;  %v78_v58 = vmul.f32 %v74_v55, %v74_v55  ;;  %v104_v21 = vsub.f32 %v949_v0, %v74_v55  ;;  %v105_v22 = vsub.f32 %v954_v1, %v74_v55  ;;  %v828_v55 = vld [vmem:[#allocation4 + $0x90] ss:$8 sps:$4 sm:$0xff]   ;;  %v829_v56 = vld [vmem:[#allocation4 + $0x84] ss:$8 sps:$4 sm:$0xff]  }
  0xab   :  { %v63_v59 = vpop.xlane.xlu0 %62 }
  0xac   :  { %v80_v60 = vsub.f32 %v76_v57, %v78_v58  ;;  %v75_v61 = vmul.f32 0.03125, %v63_v59  ;;  %v831_v57 = vld [vmem:[#allocation4 + $0x80] ss:$8 sps:$4 sm:$0xff]  }
  0xad   :  { %v73_v62 = vpop.xlane.xlu1 %72  ;;  %v162_v58 = vld [vmem:[%s1022_s4] sm:$0x3] }
  0xae   :  { %v82_v63 = vmax.f32 %v80_v60, 0.0  ;;  %v77_v3 = vmul.f32 0.03125, %v73_v62  ;;  %v79_v4 = vmul.f32 %v75_v61, %v75_v61  ;;  %v106_v24 = vsub.f32 %v959_v2, %v75_v61  ;;  %v799_v2 = vld [vmem:[#allocation4 + $0x24] ss:$8 sps:$4 sm:$0xff]  }
  0xaf   :  { %v107_v25 = vsub.f32 %v970_v6, %v75_v61  ;;  %v801_v6 = vld [vmem:[#allocation4 + $0x20] ss:$8 sps:$4 sm:$0xff]   ;;  %621 = vmatprep.subr.bf16.mxu1 %v799_v2  ;;  %v167_v59 = vrot.slane %v162_v58, %v978_v12  ;;  %v171_v60 = vrot.slane %v162_v58, %v980_v13 }
  0xb0   :  { %v84_v5 = vadd.f32 1e-05, %v82_v63  ;;  %v81_v7 = vsub.f32 %v77_v3, %v79_v4  ;;  %622 = vmatpush1.bf16.msra.mxu1 %v801_v6 }
  0xb1   :  { %623 = vmatprep.subr.bf16.mxu1 %v802_v38 }
  0xb2   :  { %832 = vrsqrt.f32 %v84_v5  ;;  %v83_v9 = vmax.f32 %v81_v7, 0.0 }
  0xb4   :  { %v85_v10 = vadd.f32 1e-05, %v83_v9  ;;  %624 = vmatpush1.bf16.msra.mxu1 %v804_v39 }
  0xb5   :  { %625 = vmatprep.subr.bf16.mxu1 %v805_v40 }
  0xb6   :  { %834 = vrsqrt.f32 %v85_v10 }
  0xb8   :  { %626 = vmatpush1.bf16.msra.mxu1 %v807_v41 }
  0xb9   :  { %627 = vmatprep.subr.bf16.mxu1 %v808_v42 }
  0xbc   :  { %628 = vmatpush2.bf16.msra.mxu1 %v810_v43 }
  0xbd   :  { %629 = vmatprep.subr.bf16.mxu1 %v811_v44 }
  0xbf   :  { %v833_v17 = vpop.eup %832 }
  0xc0   :  { %v101_v18 = vmul.f32 %v833_v17, %v97_v16  ;;  %v100_v20 = vmul.f32 %v833_v17, %v93_v15  ;;  %630 = vmatpush2.bf16.msra.mxu1 %v813_v45 }
  0xc1   :  { %631 = vmatprep.subr.bf16.mxu1 %v814_v46 }
  0xc2   :  { %v109_v29 = vmul.f32 %v105_v22, %v101_v18  ;;  %v108_v31 = vmul.f32 %v104_v21, %v100_v20 }
  0xc3   :  { %v835_v23 = vpop.eup %834 }
  0xc4   :  { %v103_v28 = vmul.f32 %v835_v23, %v97_v16  ;;  %v102_v30 = vmul.f32 %v835_v23, %v93_v15  ;;  %v125_v34 = vadd.f32 %v121_v27, %v109_v29  ;;  %v124_v0 = vadd.f32 %v117_v26, %v108_v31  ;;  %632 = vmatpush2.bf16.msra.mxu1 %v816_v47 }
  0xc5   :  { %633 = vmatprep.subr.bf16.mxu1 %v817_v48 }
  0xc6   :  { %v111_v32 = vmul.f32 %v107_v25, %v103_v28  ;;  %v110_v33 = vmul.f32 %v106_v24, %v102_v30 }
  0xc8   :  { %v127_v35 = vadd.f32 %v121_v27, %v111_v32  ;;  %v126_v36 = vadd.f32 %v117_v26, %v110_v33  ;;  %634 = vmatpush2.bf16.msra.mxu1 %v819_v49  ;;  %v439_v33 = vld [vmem:[%s1024_s6] sm:$0x3] }
  0xc9   :  { %635 = vmatprep.subr.bf16.mxu1 %v820_v50 }
  0xca   :  { %v129_v1 = vpack.c.bf16 %v127_v35, %v125_v34  ;;  %v128_v37 = vpack.c.bf16 %v126_v36, %v124_v0  ;;  %v444_v34 = vrot.slane %v439_v33, %v978_v12  ;;  %v448_v35 = vrot.slane %v439_v33, %v980_v13 }
  0xcc   :  { %366 = vmatprep.mubr.bf16.mxu0 %v129_v1  ;;  %636 = vmatpush2.bf16.msra.mxu1 %v822_v51 }
  0xcd   :  { %367 = vmatmul.mubr.bf16.vlgmr.msra.gmra.mxu0 %v128_v37  ;;  %637 = vmatprep.subr.bf16.mxu1 %v823_v52 }
  0xd0   :  { %638 = vmatpush2.bf16.msra.mxu1 %v825_v53 }
  0xd1   :  { %639 = vmatprep.subr.bf16.mxu1 %v826_v54 }
  0xd4   :  { %640 = vmatpush2.bf16.msra.mxu1 %v828_v55 }
  0xd5   :  { %641 = vmatprep.subr.bf16.mxu1 %v829_v56 }
  0xd8   :  { %642 = vmatpush2.bf16.msra.mxu1 %v831_v57 }
 0x18d   :  { %v368_v61 = vpop.f32.mrf.mxu0 }
 0x18e   :  { %v369_v62 = vadd.f32 %v368_v61, %v167_v59 }
 0x18f   :  { %v370_v63 = vpop.f32.mrf.mxu0 }
 0x190   :  { %v696_v3 = vmul.f32 -1.442695, %v369_v62  ;;  %v371_v4 = vadd.f32 %v370_v63, %v171_v60 }
 0x191   :  { %v372_v5 = vpop.f32.mrf.mxu0 }
 0x192   :  { %v697_v7 = vmul.f32 -1.442695, %v371_v4  ;;  %v373_v8 = vadd.f32 %v372_v5, %v167_v59  ;;  %836 = vpow2.f32 %v696_v3 }
 0x193   :  { %v374_v9 = vpop.f32.mrf.mxu0 }
 0x194   :  { %838 = vpow2.f32 %v697_v7  ;;  %v698_v10 = vmul.f32 -1.442695, %v373_v8  ;;  %v375_v11 = vadd.f32 %v374_v9, %v171_v60 }
 0x196   :  { %840 = vpow2.f32 %v698_v10  ;;  %v699_v14 = vmul.f32 -1.442695, %v375_v11 }
 0x198   :  { %842 = vpow2.f32 %v699_v14 }
 0x19f   :  { %v837_v15 = vpop.eup %836 }
 0x1a0   :  { %v389_v19 = vadd.f32 1.0, %v837_v15 }
 0x1a1   :  { %v839_v16 = vpop.eup %838 }
 0x1a2   :  { %v390_v17 = vadd.f32 1.0, %v839_v16 }
 0x1a3   :  { %v841_v18 = vpop.eup %840 }
 0x1a4   :  { %v391_v20 = vadd.f32 1.0, %v841_v18  ;;  %844 = vrcp.f32 %v390_v17 }
 0x1a5   :  { %v843_v21 = vpop.eup %842 }
 0x1a6   :  { %846 = vrcp.f32 %v391_v20  ;;  %v392_v22 = vadd.f32 1.0, %v843_v21 }
 0x1a7   :  { %848 = vrcp.f32 %v389_v19 }
 0x1a8   :  { %850 = vrcp.f32 %v392_v22 }
 0x1b1   :  { %v845_v23 = vpop.eup %844 }
 0x1b2   :  { %v402_v28 = vmul.f32 %v845_v23, %v371_v4 }
 0x1b3   :  { %v847_v24 = vpop.eup %846 }
 0x1b4   :  { %v849_v25 = vpop.eup %848  ;;  %v403_v27 = vmul.f32 %v847_v24, %v373_v8 }
 0x1b5   :  { %v851_v26 = vpop.eup %850  ;;  %v401_v30 = vmul.f32 %v849_v25, %v369_v62 }
 0x1b6   :  { %v404_v29 = vmul.f32 %v851_v26, %v375_v11 }
 0x1b7   :  { %v405_v32 = vpack.c.bf16 %v403_v27, %v401_v30 }
 0x1b8   :  { %v406_v31 = vpack.c.bf16 %v404_v29, %v402_v28 }
 0x1ba   :  { %643 = vmatprep.mubr.bf16.mxu1 %v406_v31 }
 0x1bb   :  { %644 = vmatmul.mubr.bf16.vlgmr.msra.gmra.mxu1 %v405_v32 }
 0x27b   :  { %v645_v0 = vpop.f32.mrf.mxu1 }
 0x27c   :  { %v646_v36 = vadd.f32 %v645_v0, %v444_v34 }
 0x27d   :  { %v647_v1 = vpop.f32.mrf.mxu1 }
 0x27e   :  { %654 = vst [vmem:[%s1025_s7] sm:$0xff] %v646_v36  ;;  %v648_v37 = vadd.f32 %v647_v1, %v448_v35 }
 0x27f   :  { %v649_v2 = vpop.f32.mrf.mxu1 }
 0x280   :  { %655 = vst [vmem:[%s1025_s7 + $0x8] sm:$0xff] %v648_v37  ;;  %v650_v6 = vadd.f32 %v649_v2, %v444_v34 }
 0x281   :  { %v651_v38 = vpop.f32.mrf.mxu1 }
 0x282   :  { %656 = vst [vmem:[%s1025_s7 + $0x10] sm:$0xff] %v650_v6  ;;  %v652_v12 = vadd.f32 %v651_v38, %v448_v35 }
 0x284   :  { %657 = vst [vmem:[%s1025_s7 + $0x18] sm:$0xff] %v652_v12 }
 0x285   :  { %662 = vsyncpa [#allocation3], 1 }
 0x286   :  { %663 = vsyncpa [#allocation5], 1 }

</bundles_post_ra>
